<compile_context>
chip_gen: v7x
topology: tpu7x:2x2x1
jax: 0.10.0
libtpu: 0.0.40
codegen_flags: <defaults>
</compile_context>

<pallas_src>
import functools

import numpy as np
import jax
import jax.numpy as jnp
from jax.experimental import pallas as pl
from jax.experimental.pallas import tpu as pltpu

V = 128              # vertices (synthetic small mesh; real SMPL has 6890)
J = 24               # joints
NB = 10              # shape betas
P = (J - 1) * 9      # 207 pose-blendshape coefficients
B = 2                # batch size
BPAD = 8             # batch padded to a full sublane tile for the blend matmul
C3V = 3 * V          # 384: coordinate-major flattened vertex block [x_0..x_V, y_..., z_...]
JBLK = 128           # joint output block padded to a full lane tile (3*J = 72 -> 128)
NOUT = C3V + JBLK    # 512: lane-dense blend-kernel output width
KCOEF = NB + 9 * J + 1   # 227: [betas | all 24 rotmats | bias-1 column]
KBIAS = NB + 9 * J       # 226: index of the constant-1 bias column / bias weight row
KPAD = 256               # K padded to a clean lane multiple

# SMPL kinematic tree (parents[0] is the unused root entry)
PARENTS = [0, 0, 0, 0, 1, 2, 3, 4, 5, 6, 7, 8, 9, 9, 9, 12, 13, 14, 16, 17, 18, 19, 20, 21]
# SMPL joints are ordered by tree depth -> contiguous per-depth index ranges (root = joint 0)
LEVELS = [(1, 4), (4, 7), (7, 10), (10, 15), (15, 18), (18, 20), (20, 22), (22, 24)]


# ----------------------------- Pallas kernels --------------------------------

def _blend_kernel(coeffs_ref, w_ref, out_ref):
    # coeffs:(8,256)=[betas | rot(216) | 1 | 0-pad]   w:(256,512) bf16   out:(8,512) f32
    # out[:, :384]    = v_posed (coordinate-major flat); bias row folds v_template and the
    #                   "-identity" pose-map correction.
    # out[:, 384:456] = joint positions (coordinate-major flat); remaining lanes zero padding.
    out_ref[...] = jnp.dot(coeffs_ref[...].astype(jnp.bfloat16), w_ref[...],
                           preferred_element_type=jnp.float32)


def blend_pallas(coeffs_pad, blend_w):
    return pl.pallas_call(
        _blend_kernel,
        out_shape=jax.ShapeDtypeStruct((BPAD, NOUT), jnp.float32),
        in_specs=[pl.BlockSpec(memory_space=pltpu.MemorySpace.VMEM),
                  pl.BlockSpec(memory_space=pltpu.MemorySpace.VMEM)],
        out_specs=pl.BlockSpec(memory_space=pltpu.MemorySpace.VMEM),
    )(coeffs_pad, blend_w)


def _skin_kernel(r2_ref, wt_ref, rest_ref, out_ref):
    # r2:(32, J) rows ordered [c, b, r] (index 8c+4b+r)   wt:(J, V) bf16
    # rest:(32, V) rows ordered [c, b, r] with value rest[b, c] (independent of r)
    # out:(8, V) rows [b, r]:  out[4b+r] = sum_c T[8c+4b+r] * rest[8c+4b+r]
    T = jnp.dot(r2_ref[...].astype(jnp.bfloat16), wt_ref[...],
                preferred_element_type=jnp.float32)                    # (32, V)
    rest = rest_ref[...]                                               # (32, V)
    rows = B * 4                                                       # 8 -> sublane-aligned
    acc = T[0:rows, :] * rest[0:rows, :]                               # c = 0
    for c in range(1, 4):
        acc = acc + T[c * rows:(c + 1) * rows, :] * rest[c * rows:(c + 1) * rows, :]
    out_ref[...] = acc                                                 # single dense (8,128) store


def skin_pallas(r2_flat, weights_T, rest_exp):
    return pl.pallas_call(
        _skin_kernel,
        out_shape=jax.ShapeDtypeStruct((B * 4, V), jnp.float32),
        in_specs=[pl.BlockSpec(memory_space=pltpu.MemorySpace.VMEM),
                  pl.BlockSpec(memory_space=pltpu.MemorySpace.VMEM),
                  pl.BlockSpec(memory_space=pltpu.MemorySpace.VMEM)],
        out_specs=pl.BlockSpec(memory_space=pltpu.MemorySpace.VMEM),
    )(r2_flat, weights_T, rest_exp)


# ------------------------- JAX glue (batched, jitted) -------------------------

def _quat2mat(quat):
    nq = quat / jnp.linalg.norm(quat, axis=1, keepdims=True)
    w, x, y, z = nq[:, 0], nq[:, 1], nq[:, 2], nq[:, 3]
    w2, x2, y2, z2 = w * w, x * x, y * y, z * z
    wx, wy, wz = w * x, w * y, w * z
    xy, xz, yz = x * y, x * z, y * z
    return jnp.stack([w2 + x2 - y2 - z2, 2 * xy - 2 * wz, 2 * wy + 2 * xz,
                      2 * wz + 2 * xy, w2 - x2 + y2 - z2, 2 * yz - 2 * wx,
                      2 * xz - 2 * wy, 2 * wx + 2 * yz, w2 - x2 - y2 + z2], axis=1)


def batch_rodrigues(axisang):  # (N, 3) -> (N, 9)
    angle = jnp.linalg.norm(axisang + 1e-8, axis=1, keepdims=True)
    normed = axisang / angle
    quat = jnp.concatenate([jnp.cos(angle), jnp.sin(angle) * normed], axis=1)
    return _quat2mat(quat)


def _with_zeros(t):  # (B,3,4) -> (B,4,4)
    pad = jnp.tile(jnp.array([[[0.0, 0.0, 0.0, 1.0]]], dtype=t.dtype), (t.shape[0], 1, 1))
    return jnp.concatenate([t, pad], axis=1)


def _pallas_chain_and_skin(rot, th_j, v_posed_cv, prm):
    """Batched kinematic chain + Pallas skinning. rot:(B,216) th_j:(B,J,3) v_posed_cv:(B,3,V)."""
    Bsz = rot.shape[0]
    hp = jax.lax.Precision.HIGHEST
    all_rot = rot.reshape(Bsz, J, 3, 3)                                        # joint 0 == root rot

    # batched relative transforms (B, J, 4, 4)
    parent_idx = np.array(PARENTS)
    root_mask = jnp.ones((J,), jnp.float32).at[0].set(0.0)
    parent_pos = th_j[:, parent_idx, :] * root_mask[None, :, None]
    rel_pos = th_j - parent_pos                                                # root keeps th_j[:,0]
    rel_top = jnp.concatenate([all_rot, rel_pos[..., None]], axis=3)           # (B,J,3,4)
    bottom = jnp.broadcast_to(jnp.array([0.0, 0.0, 0.0, 1.0], jnp.float32), (Bsz, J, 1, 4))
    rel44 = jnp.concatenate([rel_top, bottom], axis=2)                         # (B,J,4,4)

    # level-wise parent composition over the static tree (8 batched 4x4 matmuls)
    results_all = rel44[:, 0:1]                                                # root global
    for lo, hi in LEVELS:
        par = results_all[:, np.array(PARENTS[lo:hi])]                         # (B,n,4,4)
        results_all = jnp.concatenate(
            [results_all, jnp.matmul(par, rel44[:, lo:hi], precision=hp)], axis=1)
    jtr = results_all[:, :, :3, 3]                                             # (B,J,3)

    # batched th_results2 packing
    j_h = jnp.concatenate([th_j, jnp.zeros((Bsz, J, 1), th_j.dtype)], axis=2)  # (B,J,4)
    tmp = jnp.einsum("bjrk,bjk->bjr", results_all, j_h, precision=hp)          # (B,J,4)
    pack = jnp.concatenate([jnp.zeros((Bsz, J, 4, 3), tmp.dtype), tmp[..., None]], axis=3)
    r2 = results_all - pack                                                    # [b,j,r,c] = results2[b,r,c,j]

    # rows ordered [c, b, r] (index 8c+4b+r) so the skin kernel's c-reduction is 4 aligned
    # whole-vreg (8,128) FMAs; rest expanded to the matching row order (value independent of r).
    r2_flat = jnp.transpose(r2, (3, 0, 2, 1)).reshape(4 * Bsz * 4, J)          # (32, J)
    rest4 = jnp.concatenate([v_posed_cv, jnp.ones((Bsz, 1, V), jnp.float32)], axis=1)  # (B,4,V)
    rest_exp = jnp.broadcast_to(rest4.transpose(1, 0, 2)[:, :, None, :],
                                (4, Bsz, 4, V)).reshape(4 * Bsz * 4, V)        # (32, V)

    verts4 = skin_pallas(r2_flat, prm["weights_T"], rest_exp).reshape(Bsz, 4, V)
    verts = verts4[:, :3, :].transpose(0, 2, 1)                                # (B,V,3)
    return verts, jtr


def _reference_chain_and_skin(rot, th_j, v_posed_cv, prm):
    """Direct (un-batched) translation of the PyTorch module, HIGHEST precision."""
    Bsz = rot.shape[0]
    hp = jax.lax.Precision.HIGHEST
    root_rot = rot[:, :9].reshape(Bsz, 3, 3)
    results = [None] * J
    root_j = th_j[:, 0, :].reshape(Bsz, 3, 1)
    results[0] = _with_zeros(jnp.concatenate([root_rot, root_j], axis=2))
    for i in range(1, J):
        joint_rot = rot[:, 9 * i:9 * (i + 1)].reshape(Bsz, 3, 3)
        joint_j = th_j[:, i].reshape(Bsz, 3, 1)
        parent_j = th_j[:, PARENTS[i]].reshape(Bsz, 3, 1)
        rel = _with_zeros(jnp.concatenate([joint_rot, joint_j - parent_j], axis=2))
        results[i] = jnp.matmul(results[PARENTS[i]], rel, precision=hp)

    r2l = []
    for i in range(J):
        jh = jnp.concatenate([th_j[:, i], jnp.zeros((Bsz, 1), th_j.dtype)], axis=1)
        tmp = jnp.matmul(results[i], jh[:, :, None], precision=hp)
        packed = jnp.concatenate([jnp.zeros((Bsz, 4, 3), tmp.dtype), tmp], axis=2)
        r2l.append(results[i] - packed)
    results2 = jnp.stack(r2l, axis=-1)                                         # (B,4,4,J)

    rest_h = jnp.concatenate([v_posed_cv, jnp.ones((Bsz, 1, V), jnp.float32)], axis=1)
    th_T = jnp.einsum("brcj,vj->brcv", results2, prm["weights"], precision=hp)
    verts4 = (th_T * rest_h[:, None, :, :]).sum(2)
    verts = verts4[:, :3, :].transpose(0, 2, 1)
    jtr = jnp.stack(results, axis=1)[:, :, :3, 3]
    return verts, jtr


@functools.partial(jax.jit, static_argnames=("use_pallas",))
def smpl_forward(pose_axisang, th_betas, th_trans, prm, use_pallas=True):
    Bsz = pose_axisang.shape[0]
    rot = batch_rodrigues(pose_axisang.reshape(-1, 3)).reshape(Bsz, J * 9)     # (B, 216)

    if use_pallas:
        # coeffs = [betas | all 24 rotmats | 1]; the "-identity" pose-map correction,
        # v_template and the joint offsets are folded into blend_w's bias row.
        coeffs = jnp.concatenate(
            [th_betas, rot, jnp.ones((Bsz, 1), jnp.float32)], axis=1)          # (B, 227)
        coeffs = jnp.pad(coeffs, ((0, BPAD - Bsz), (0, KPAD - KCOEF)))         # (8, 256)
        blend_out = blend_pallas(coeffs, prm["blend_w"])                       # (8, 512)
        v_posed_cv = blend_out[:Bsz, :C3V].reshape(Bsz, 3, V)                  # (B,3,V)
        th_j = blend_out[:Bsz, C3V:C3V + 3 * J].reshape(Bsz, 3, J).transpose(0, 2, 1)
        verts, jtr = _pallas_chain_and_skin(rot, th_j, v_posed_cv, prm)
    else:
        hp = jax.lax.Precision.HIGHEST
        id_flat = jnp.tile(jnp.eye(3, dtype=rot.dtype).reshape(1, 9), (1, J - 1))
        pose_map = rot[:, 9:] - id_flat                                        # (B, 207)
        v_shaped = prm["v_template"][None] + jnp.einsum(
            "bk,vck->bvc", th_betas, prm["shapedirs"], precision=hp)
        th_j = jnp.einsum("jv,bvc->bjc", prm["J_regressor"], v_shaped, precision=hp)
        v_posed = v_shaped + jnp.einsum(
            "bk,vck->bvc", pose_map, prm["posedirs"], precision=hp)
        v_posed_cv = v_posed.transpose(0, 2, 1)
        verts, jtr = _reference_chain_and_skin(rot, th_j, v_posed_cv, prm)

    # th_trans is non-zero here -> PyTorch takes the "apply translation" branch
    jtr = jtr + th_trans[:, None, :]
    verts = verts + th_trans[:, None, :]
    return verts, jtr


# ------------------------------ parameter setup -------------------------------

def make_params(key):
    hp = jax.lax.Precision.HIGHEST
    ks = jax.random.split(key, 5)
    v_template = 0.1 * jax.random.normal(ks[0], (V, 3), jnp.float32)
    shapedirs = 0.01 * jax.random.normal(ks[1], (V, 3, NB), jnp.float32)
    posedirs = 0.01 * jax.random.normal(ks[2], (V, 3, P), jnp.float32)
    J_regressor = jax.nn.softmax(jax.random.normal(ks[3], (J, V), jnp.float32), axis=1)
    weights = jax.nn.softmax(2.0 * jax.random.normal(ks[4], (V, J), jnp.float32), axis=1)

    prm = dict(v_template=v_template, shapedirs=shapedirs, posedirs=posedirs,
               J_regressor=J_regressor, weights=weights)

    # coordinate-major flat layouts
    vt_flat = v_template.T.reshape(1, C3V)                                     # (1, 3V)
    SD_flat = jnp.transpose(shapedirs, (2, 1, 0)).reshape(NB, C3V)             # (10, 3V)
    PD_flat = jnp.transpose(posedirs, (2, 1, 0)).reshape(P, C3V)               # (207, 3V)
    Jreg_big = jnp.kron(jnp.eye(3, dtype=jnp.float32), J_regressor.T)          # (3V, 3J) offline only
    SDJ = jnp.matmul(SD_flat, Jreg_big, precision=hp)                          # (10, 3J)
    vtJ = jnp.matmul(vt_flat, Jreg_big, precision=hp)                          # (1, 3J)
    id_flat = jnp.tile(jnp.eye(3, dtype=jnp.float32).reshape(1, 9), (1, J - 1))  # (1, 207)

    # fused blend weight: one (256, 512) matmul on coeffs [betas | rot | 1 | pad] produces
    # [v_posed | joints (lane-padded to 128)].  Bias row folds v_template, the joint offsets
    # and the "-identity" pose-map correction; root-rotation rows (10..18) stay zero.
    blend_w = jnp.zeros((KPAD, NOUT), jnp.float32)
    blend_w = blend_w.at[:NB, :C3V].set(SD_flat)
    blend_w = blend_w.at[NB + 9:NB + 9 + P, :C3V].set(PD_flat)
    blend_w = blend_w.at[:NB, C3V:C3V + 3 * J].set(SDJ)
    bias_verts = vt_flat - jnp.matmul(id_flat, PD_flat, precision=hp)          # (1, 3V)
    blend_w = blend_w.at[KBIAS, :C3V].set(bias_verts[0])
    blend_w = blend_w.at[KBIAS, C3V:C3V + 3 * J].set(vtJ[0])

    # bf16 storage for both MXU weight operands (f32 accumulation inside the kernels)
    prm["blend_w"] = blend_w.astype(jnp.bfloat16)                              # (256, 512)
    prm["weights_T"] = weights.T.astype(jnp.bfloat16)                          # (J, V)
    return prm


if __name__ == "__main__":
    key = jax.random.PRNGKey(0)
    kp, k1, k2, k3 = jax.random.split(key, 4)
    prm = make_params(kp)

    pose = 0.2 * jax.random.normal(k1, (B, J * 3), jnp.float32)   # axis-angle (B, 72)
    betas = jax.random.normal(k2, (B, NB), jnp.float32)           # (B, 10), non-zero norm
    trans = 0.1 * jax.random.normal(k3, (B, 3), jnp.float32)      # (B, 3), non-zero norm

    verts, jtr = smpl_forward(pose, betas, trans, prm, use_pallas=True)
    jax.block_until_ready((verts, jtr))

    ref_verts, ref_jtr = smpl_forward(pose, betas, trans, prm, use_pallas=False)
    # tolerances account for bf16 MXU inputs vs. the f32 Precision.HIGHEST reference path
    np.testing.assert_allclose(np.asarray(verts), np.asarray(ref_verts), rtol=2e-2, atol=5e-3)
    np.testing.assert_allclose(np.asarray(jtr), np.asarray(ref_jtr), rtol=2e-2, atol=5e-3)
    assert verts.shape == (B, V, 3) and jtr.shape == (B, J, 3)

    print("KERNEL_OK")
</pallas_src>

<mosaic_0001>
module attributes {stable_mosaic.version = 11 : i64} {
  func.func @_blend_kernel(%arg0: memref<8x256xf32, #tpu.memory_space<vmem>>, %arg1: memref<256x512xbf16, #tpu.memory_space<vmem>>, %arg2: memref<8x512xf32, #tpu.memory_space<vmem>>) attributes {dimension_semantics = [], scalar_prefetch = 0 : i64, scratch_operands = 0 : i64, tpu.core_type = #tpu.core_type<tc>} {
    %c0 = arith.constant 0 : index
    %c0_0 = arith.constant 0 : index
    %0 = vector.load %arg0[%c0, %c0_0] : memref<8x256xf32, #tpu.memory_space<vmem>>, vector<8x256xf32>
    %1 = arith.truncf %0 : vector<8x256xf32> to vector<8x256xbf16>
    %c0_1 = arith.constant 0 : index
    %c0_2 = arith.constant 0 : index
    %2 = vector.load %arg1[%c0_1, %c0_2] : memref<256x512xbf16, #tpu.memory_space<vmem>>, vector<256x512xbf16>
    %cst = arith.constant dense<0.000000e+00> : vector<8x512xf32>
    %3 = tpu.matmul %1, %2, %cst {dimension_numbers = #tpu.dot_dimension_numbers<[1], [0], [0], [1], [0, 0, 1, 1], [], []>} : vector<8x256xbf16>, vector<256x512xbf16>, vector<8x512xf32> -> vector<8x512xf32>
    %c0_3 = arith.constant 0 : index
    %c0_4 = arith.constant 0 : index
    %4 = vector.load %arg2[%c0_3, %c0_4] : memref<8x512xf32, #tpu.memory_space<vmem>>, vector<8x512xf32>
    tpu.vector_store %arg2[%c0_3, %c0_4], %3 {strides = array<i32>} : memref<8x512xf32, #tpu.memory_space<vmem>>, vector<8x512xf32>,
    return
  }
}

module attributes {stable_mosaic.version = 11 : i64} {
  func.func @_skin_kernel(%arg0: memref<32x24xf32, #tpu.memory_space<vmem>>, %arg1: memref<24x128xbf16, #tpu.memory_space<vmem>>, %arg2: memref<32x128xf32, #tpu.memory_space<vmem>>, %arg3: memref<8x128xf32, #tpu.memory_space<vmem>>) attributes {dimension_semantics = [], scalar_prefetch = 0 : i64, scratch_operands = 0 : i64, tpu.core_type = #tpu.core_type<tc>} {
    %c0 = arith.constant 0 : index
    %c0_0 = arith.constant 0 : index
    %0 = vector.load %arg0[%c0, %c0_0] : memref<32x24xf32, #tpu.memory_space<vmem>>, vector<32x24xf32>
    %1 = arith.truncf %0 : vector<32x24xf32> to vector<32x24xbf16>
    %c0_1 = arith.constant 0 : index
    %c0_2 = arith.constant 0 : index
    %2 = vector.load %arg1[%c0_1, %c0_2] : memref<24x128xbf16, #tpu.memory_space<vmem>>, vector<24x128xbf16>
    %cst = arith.constant dense<0.000000e+00> : vector<32x128xf32>
    %3 = tpu.matmul %1, %2, %cst {dimension_numbers = #tpu.dot_dimension_numbers<[1], [0], [0], [1], [0, 0, 1, 1], [], []>} : vector<32x24xbf16>, vector<24x128xbf16>, vector<32x128xf32> -> vector<32x128xf32>
    %c0_3 = arith.constant 0 : index
    %c0_4 = arith.constant 0 : index
    %4 = vector.load %arg2[%c0_3, %c0_4] : memref<32x128xf32, #tpu.memory_space<vmem>>, vector<32x128xf32>
    %5 = vector.extract_strided_slice %3 {offsets = [0, 0], sizes = [8, 128], strides = [1, 1]} : vector<32x128xf32> to vector<8x128xf32>
    %6 = vector.extract_strided_slice %4 {offsets = [0, 0], sizes = [8, 128], strides = [1, 1]} : vector<32x128xf32> to vector<8x128xf32>
    %7 = arith.mulf %5, %6 : vector<8x128xf32>
    %8 = vector.extract_strided_slice %3 {offsets = [8, 0], sizes = [8, 128], strides = [1, 1]} : vector<32x128xf32> to vector<8x128xf32>
    %9 = vector.extract_strided_slice %4 {offsets = [8, 0], sizes = [8, 128], strides = [1, 1]} : vector<32x128xf32> to vector<8x128xf32>
    %10 = arith.mulf %8, %9 : vector<8x128xf32>
    %11 = arith.addf %7, %10 : vector<8x128xf32>
    %12 = vector.extract_strided_slice %3 {offsets = [16, 0], sizes = [8, 128], strides = [1, 1]} : vector<32x128xf32> to vector<8x128xf32>
    %13 = vector.extract_strided_slice %4 {offsets = [16, 0], sizes = [8, 128], strides = [1, 1]} : vector<32x128xf32> to vector<8x128xf32>
    %14 = arith.mulf %12, %13 : vector<8x128xf32>
    %15 = arith.addf %11, %14 : vector<8x128xf32>
    %16 = vector.extract_strided_slice %3 {offsets = [24, 0], sizes = [8, 128], strides = [1, 1]} : vector<32x128xf32> to vector<8x128xf32>
    %17 = vector.extract_strided_slice %4 {offsets = [24, 0], sizes = [8, 128], strides = [1, 1]} : vector<32x128xf32> to vector<8x128xf32>
    %18 = arith.mulf %16, %17 : vector<8x128xf32>
    %19 = arith.addf %15, %18 : vector<8x128xf32>
    %c0_5 = arith.constant 0 : index
    %c0_6 = arith.constant 0 : index
    %20 = vector.load %arg3[%c0_5, %c0_6] : memref<8x128xf32, #tpu.memory_space<vmem>>, vector<8x128xf32>
    tpu.vector_store %arg3[%c0_5, %c0_6], %19 {strides = array<i32>} : memref<8x128xf32, #tpu.memory_space<vmem>>, vector<8x128xf32>,
    return
  }
}

</mosaic_0001>

<bundles_post_ra>
// kernel: smpl_forward.2
= control target key start
LH: loop header
LB: loop body
LE: loop exit
PB: predicated region body
PF: predicated region fallthrough
CT: control target
= control target key end

     0   :  { %7 = vsyncpa [#allocation3], 0  ;;  %s691_s9 = smov [#allocation2]   ;;  %s739_s0 = inlined_call_operand.vmem [shape: f32[8,256], index: 0, kind: input, shape index: {}]   ;;  %s740_s1 = inlined_call_operand.hbm [shape: bf16[256,512], index: 1, kind: input, shape index: {}]   ;;  %s741_s2 = inlined_call_operand.vmem [shape: f32[8,512], index: 2, kind: output, shape index: {}]  }
   0x1   :  { %s15_s10 = sshll.u32 %s691_s9, 4  ;;  %s667_s13 = scalar_lea.hbm %s740_s1, 8192  ;;  %s16_s10 = int_to_ptr.vmem [resolvable:$true] %s15_s10 }
   0x2   :  { %p668_p0 = scmp.ne.s32.totalorder %s740_s1, %s667_s13  ;;  %p671_p1 = scmp.lt.u32.totalorder %s667_s13, %s740_s1 }
   0x4   :  { %p673_p2 = pnand %p671_p1, %p668_p0 }
   0x6   :  { %676 = shalt.err (!%p673_p2)
}
   0x7   :  { %s677_s18 = scalar_lea.vmem %s16_s10, 8192  ;;  %p682_p4 = scmp.lt.s32.totalorder %s16_s10, %s16_s10 }
   0x8   :  { %p678_p3 = scmp.ne.s32.totalorder %s16_s10, %s677_s18  ;;  %p683_p5 = scmp.lt.s32.totalorder %s677_s18, %s677_s18 }
   0xa   :  { %p684_p6 = por %p683_p5, %p682_p4 }
   0xc   :  { %p685_p7 = pnand %p684_p6, %p678_p3 }
   0xe   :  { %688 = shalt.err (!%p685_p7)
}
   0xf   :  { %s692_s19 = smov 256   ;;  %s693_s20 = smov 16  }
  0x10   :  { %21 = dma.hbm_to_vmem [thread:$0]  %s740_s1, 8192, %s16_s10, [#allocation3], %s692_s19, %s692_s19, %s693_s20  }
  0x11   :  { %689 = dma.done.wait [#allocation3], 8192  }
  0x12   :  { %690 = vsyncadd [#allocation3], 4294959104  ;;  %v571_v0 = vld [vmem:[#allocation2 + $0x4] ss:$16 sps:$4 sm:$0xff]   ;;  %v573_v1 = vld [vmem:[#allocation2 + $0xc] ss:$16 sps:$4 sm:$0xff]  }
  0x13   :  { %413 = vmatprep.subr.bf16.mxu0 %v571_v0  ;;  %v575_v2 = vld [vmem:[#allocation2] ss:$16 sps:$4 sm:$0xff]   ;;  %v576_v3 = vld [vmem:[#allocation2 + $0x8] ss:$16 sps:$4 sm:$0xff]   ;;  %454 = vmatprep.subr.bf16.mxu1 %v573_v1  ;;  %v577_v4 = vld [vmem:[#allocation2 + $0x24] ss:$16 sps:$4 sm:$0xff]  }
  0x14   :  { %414 = vmatpush1.bf16.msra.mxu0 %v575_v2  ;;  %455 = vmatpush1.bf16.msra.mxu1 %v576_v3  ;;  %v579_v5 = vld [vmem:[#allocation2 + $0x2c] ss:$16 sps:$4 sm:$0xff]   ;;  %v581_v6 = vld [vmem:[#allocation2 + $0x20] ss:$16 sps:$4 sm:$0xff]   ;;  %v582_v7 = vld [vmem:[#allocation2 + $0x28] ss:$16 sps:$4 sm:$0xff]  }
  0x15   :  { %415 = vmatprep.subr.bf16.mxu0 %v577_v4  ;;  %456 = vmatprep.subr.bf16.mxu1 %v579_v5  ;;  %v583_v8 = vld [vmem:[#allocation2 + $0x44] ss:$16 sps:$4 sm:$0xff]   ;;  %v585_v9 = vld [vmem:[#allocation2 + $0x4c] ss:$16 sps:$4 sm:$0xff]   ;;  %v587_v10 = vld [vmem:[#allocation2 + $0x40] ss:$16 sps:$4 sm:$0xff]  }
  0x16   :  { %v588_v11 = vld [vmem:[#allocation2 + $0x48] ss:$16 sps:$4 sm:$0xff]   ;;  %v589_v12 = vld [vmem:[#allocation2 + $0x64] ss:$16 sps:$4 sm:$0xff]   ;;  %v591_v13 = vld [vmem:[#allocation2 + $0x6c] ss:$16 sps:$4 sm:$0xff]  }
  0x17   :  { %v593_v14 = vld [vmem:[#allocation2 + $0x60] ss:$16 sps:$4 sm:$0xff]   ;;  %v594_v15 = vld [vmem:[#allocation2 + $0x68] ss:$16 sps:$4 sm:$0xff]   ;;  %v595_v16 = vld [vmem:[#allocation2 + $0x84] ss:$16 sps:$4 sm:$0xff]  }
  0x18   :  { %416 = vmatpush1.bf16.msra.mxu0 %v581_v6  ;;  %457 = vmatpush1.bf16.msra.mxu1 %v582_v7  ;;  %v597_v17 = vld [vmem:[#allocation2 + $0x8c] ss:$16 sps:$4 sm:$0xff]   ;;  %v599_v18 = vld [vmem:[#allocation2 + $0x80] ss:$16 sps:$4 sm:$0xff]   ;;  %v600_v19 = vld [vmem:[#allocation2 + $0x88] ss:$16 sps:$4 sm:$0xff]  }
  0x19   :  { %417 = vmatprep.subr.bf16.mxu0 %v583_v8  ;;  %458 = vmatprep.subr.bf16.mxu1 %v585_v9  ;;  %v601_v20 = vld [vmem:[#allocation2 + $0xa4] ss:$16 sps:$4 sm:$0xff]   ;;  %v603_v21 = vld [vmem:[#allocation2 + $0xac] ss:$16 sps:$4 sm:$0xff]   ;;  %v605_v22 = vld [vmem:[#allocation2 + $0xa0] ss:$16 sps:$4 sm:$0xff]  }
  0x1a   :  { %v606_v23 = vld [vmem:[#allocation2 + $0xa8] ss:$16 sps:$4 sm:$0xff]   ;;  %v607_v24 = vld [vmem:[#allocation2 + $0xc4] ss:$16 sps:$4 sm:$0xff]   ;;  %v609_v25 = vld [vmem:[#allocation2 + $0xcc] ss:$16 sps:$4 sm:$0xff]  }
  0x1b   :  { %v611_v26 = vld [vmem:[#allocation2 + $0xc0] ss:$16 sps:$4 sm:$0xff]   ;;  %v612_v27 = vld [vmem:[#allocation2 + $0xc8] ss:$16 sps:$4 sm:$0xff]   ;;  %v613_v28 = vld [vmem:[#allocation2 + $0xe4] ss:$16 sps:$4 sm:$0xff]  }
  0x1c   :  { %418 = vmatpush1.bf16.msra.mxu0 %v587_v10  ;;  %459 = vmatpush1.bf16.msra.mxu1 %v588_v11  ;;  %v615_v29 = vld [vmem:[#allocation2 + $0xec] ss:$16 sps:$4 sm:$0xff]   ;;  %v617_v30 = vld [vmem:[#allocation2 + $0xe0] ss:$16 sps:$4 sm:$0xff]   ;;  %v618_v31 = vld [vmem:[#allocation2 + $0xe8] ss:$16 sps:$4 sm:$0xff]  }
  0x1d   :  { %419 = vmatprep.subr.bf16.mxu0 %v589_v12  ;;  %460 = vmatprep.subr.bf16.mxu1 %v591_v13  ;;  %v619_v32 = vld [vmem:[#allocation2 + $0x104] ss:$16 sps:$4 sm:$0xff]   ;;  %v621_v33 = vld [vmem:[#allocation2 + $0x10c] ss:$16 sps:$4 sm:$0xff]   ;;  %v623_v34 = vld [vmem:[#allocation2 + $0x100] ss:$16 sps:$4 sm:$0xff]  }
  0x1e   :  { %v624_v35 = vld [vmem:[#allocation2 + $0x108] ss:$16 sps:$4 sm:$0xff]   ;;  %v625_v36 = vld [vmem:[#allocation2 + $0x124] ss:$16 sps:$4 sm:$0xff]   ;;  %v627_v37 = vld [vmem:[#allocation2 + $0x12c] ss:$16 sps:$4 sm:$0xff]  }
  0x1f   :  { %v629_v38 = vld [vmem:[#allocation2 + $0x120] ss:$16 sps:$4 sm:$0xff]   ;;  %v630_v39 = vld [vmem:[#allocation2 + $0x128] ss:$16 sps:$4 sm:$0xff]   ;;  %v631_v40 = vld [vmem:[#allocation2 + $0x144] ss:$16 sps:$4 sm:$0xff]  }
  0x20   :  { %420 = vmatpush1.bf16.msra.mxu0 %v593_v14  ;;  %461 = vmatpush1.bf16.msra.mxu1 %v594_v15  ;;  %v633_v41 = vld [vmem:[#allocation2 + $0x14c] ss:$16 sps:$4 sm:$0xff]   ;;  %v635_v42 = vld [vmem:[#allocation2 + $0x140] ss:$16 sps:$4 sm:$0xff]   ;;  %v636_v43 = vld [vmem:[#allocation2 + $0x148] ss:$16 sps:$4 sm:$0xff]  }
  0x21   :  { %421 = vmatprep.subr.bf16.mxu0 %v595_v16  ;;  %462 = vmatprep.subr.bf16.mxu1 %v597_v17  ;;  %v637_v44 = vld [vmem:[#allocation2 + $0x164] ss:$16 sps:$4 sm:$0xff]   ;;  %v639_v45 = vld [vmem:[#allocation2 + $0x16c] ss:$16 sps:$4 sm:$0xff]   ;;  %v641_v48 = vld [vmem:[#allocation2 + $0x160] ss:$16 sps:$4 sm:$0xff]  }
  0x22   :  { %v26_v46 = vld [vmem:[%s739_s0 + $0x8] sm:$0xff]  ;;  %v643_v50 = vld [vmem:[#allocation2 + $0x184] ss:$16 sps:$4 sm:$0xff]   ;;  %v647_v52 = vld [vmem:[#allocation2 + $0x180] ss:$16 sps:$4 sm:$0xff]  }
  0x23   :  { %v28_v47 = vpack.c.bf16 %v26_v46, %v26_v46  ;;  %v642_v49 = vld [vmem:[#allocation2 + $0x168] ss:$16 sps:$4 sm:$0xff]   ;;  %v645_v51 = vld [vmem:[#allocation2 + $0x18c] ss:$16 sps:$4 sm:$0xff]   ;;  %v649_v54 = vld [vmem:[#allocation2 + $0x1a4] ss:$16 sps:$4 sm:$0xff]  }
  0x24   :  { %422 = vmatpush1.bf16.msra.mxu0 %v599_v18  ;;  %463 = vmatpush1.bf16.msra.mxu1 %v600_v19  ;;  %v648_v53 = vld [vmem:[#allocation2 + $0x188] ss:$16 sps:$4 sm:$0xff]   ;;  %v651_v55 = vld [vmem:[#allocation2 + $0x1ac] ss:$16 sps:$4 sm:$0xff]   ;;  %v653_v56 = vld [vmem:[#allocation2 + $0x1a0] ss:$16 sps:$4 sm:$0xff]  }
  0x25   :  { %423 = vmatprep.subr.bf16.mxu0 %v601_v20  ;;  %464 = vmatprep.subr.bf16.mxu1 %v603_v21  ;;  %v654_v57 = vld [vmem:[#allocation2 + $0x1a8] ss:$16 sps:$4 sm:$0xff]   ;;  %v655_v58 = vld [vmem:[#allocation2 + $0x1c4] ss:$16 sps:$4 sm:$0xff]   ;;  %v657_v59 = vld [vmem:[#allocation2 + $0x1cc] ss:$16 sps:$4 sm:$0xff]  }
  0x26   :  { %445 = vmatprep.mubr.bf16.mxu0 %v28_v47  ;;  %486 = vmatprep.mubr.bf16.mxu1 %v28_v47  ;;  %v659_v60 = vld [vmem:[#allocation2 + $0x1c0] ss:$16 sps:$4 sm:$0xff]   ;;  %v660_v61 = vld [vmem:[#allocation2 + $0x1c8] ss:$16 sps:$4 sm:$0xff]   ;;  %v661_v62 = vld [vmem:[#allocation2 + $0x1e4] ss:$16 sps:$4 sm:$0xff]  }
  0x27   :  { %v663_v63 = vld [vmem:[#allocation2 + $0x1ec] ss:$16 sps:$4 sm:$0xff]   ;;  %v665_v0 = vld [vmem:[#allocation2 + $0x1e0] ss:$16 sps:$4 sm:$0xff]   ;;  %v666_v1 = vld [vmem:[#allocation2 + $0x1e8] ss:$16 sps:$4 sm:$0xff]  }
  0x28   :  { %424 = vmatpush1.bf16.msra.mxu0 %v605_v22  ;;  %465 = vmatpush1.bf16.msra.mxu1 %v606_v23  ;;  %v25_v2 = vld [vmem:[%s739_s0] sm:$0xff] }
  0x29   :  { %425 = vmatprep.subr.bf16.mxu0 %v607_v24  ;;  %466 = vmatprep.subr.bf16.mxu1 %v609_v25  ;;  %v27_v3 = vpack.c.bf16 %v25_v2, %v25_v2 }
  0x2c   :  { %426 = vmatpush1.bf16.msra.mxu0 %v611_v26  ;;  %467 = vmatpush1.bf16.msra.mxu1 %v612_v27 }
  0x2d   :  { %427 = vmatprep.subr.bf16.mxu0 %v613_v28  ;;  %468 = vmatprep.subr.bf16.mxu1 %v615_v29 }
  0x30   :  { %428 = vmatpush1.bf16.msra.mxu0 %v617_v30  ;;  %469 = vmatpush1.bf16.msra.mxu1 %v618_v31 }
  0x31   :  { %429 = vmatprep.subr.bf16.mxu0 %v619_v32  ;;  %470 = vmatprep.subr.bf16.mxu1 %v621_v33 }
  0x34   :  { %430 = vmatpush1.bf16.msra.mxu0 %v623_v34  ;;  %471 = vmatpush1.bf16.msra.mxu1 %v624_v35 }
  0x35   :  { %431 = vmatprep.subr.bf16.mxu0 %v625_v36  ;;  %472 = vmatprep.subr.bf16.mxu1 %v627_v37 }
  0x38   :  { %432 = vmatpush1.bf16.msra.mxu0 %v629_v38  ;;  %473 = vmatpush1.bf16.msra.mxu1 %v630_v39 }
  0x39   :  { %433 = vmatprep.subr.bf16.mxu0 %v631_v40  ;;  %474 = vmatprep.subr.bf16.mxu1 %v633_v41 }
  0x3c   :  { %434 = vmatpush1.bf16.msra.mxu0 %v635_v42  ;;  %475 = vmatpush1.bf16.msra.mxu1 %v636_v43 }
  0x3d   :  { %435 = vmatprep.subr.bf16.mxu0 %v637_v44  ;;  %476 = vmatprep.subr.bf16.mxu1 %v639_v45 }
  0x40   :  { %436 = vmatpush1.bf16.msra.mxu0 %v641_v48  ;;  %477 = vmatpush1.bf16.msra.mxu1 %v642_v49 }
  0x41   :  { %437 = vmatprep.subr.bf16.mxu0 %v643_v50  ;;  %478 = vmatprep.subr.bf16.mxu1 %v645_v51 }
  0x44   :  { %438 = vmatpush1.bf16.msra.mxu0 %v647_v52  ;;  %479 = vmatpush1.bf16.msra.mxu1 %v648_v53 }
  0x45   :  { %439 = vmatprep.subr.bf16.mxu0 %v649_v54  ;;  %480 = vmatprep.subr.bf16.mxu1 %v651_v55 }
  0x48   :  { %440 = vmatpush1.bf16.msra.mxu0 %v653_v56  ;;  %481 = vmatpush1.bf16.msra.mxu1 %v654_v57 }
  0x49   :  { %441 = vmatprep.subr.bf16.mxu0 %v655_v58  ;;  %482 = vmatprep.subr.bf16.mxu1 %v657_v59 }
  0x4c   :  { %442 = vmatpush1.bf16.msra.mxu0 %v659_v60  ;;  %483 = vmatpush1.bf16.msra.mxu1 %v660_v61 }
  0x4d   :  { %443 = vmatprep.subr.bf16.mxu0 %v661_v62  ;;  %484 = vmatprep.subr.bf16.mxu1 %v663_v63 }
  0x50   :  { %444 = vmatpush1.bf16.msra.mxu0 %v665_v0  ;;  %485 = vmatpush1.bf16.msra.mxu1 %v666_v1 }
  0x53   :  { %446 = vmatmul.mubr.bf16.vlgmr.msra.gmra.mrb[0].mxu0 %v27_v3  ;;  %487 = vmatmul.mubr.bf16.vlgmr.msra.gmra.mrb[0].mxu1 %v27_v3 }
 0x126   :  { %v447_v4 = vpop.f32.mrb[0].mxu0  ;;  %v488_v5 = vpop.f32.mrb[0].mxu1 }
 0x127   :  { %495 = vst [vmem:[%s741_s2] sm:$0xff] %v447_v4  ;;  %497 = vst [vmem:[%s741_s2 + $0x10] sm:$0xff] %v488_v5  ;;  %v449_v6 = vpop.f32.mrb[1].mxu0  ;;  %v490_v7 = vpop.f32.mrb[1].mxu1 }
 0x128   :  { %496 = vst [vmem:[%s741_s2 + $0x8] sm:$0xff] %v449_v6  ;;  %498 = vst [vmem:[%s741_s2 + $0x18] sm:$0xff] %v490_v7  ;;  %v451_v8 = vpop.f32.mrb[2].mxu0  ;;  %v492_v9 = vpop.f32.mrb[2].mxu1 }
 0x129   :  { %v452_v10 = vpop.f32.mrb[3].mxu0  ;;  %v493_v11 = vpop.f32.mrb[3].mxu1 }
 0x12a   :  { %503 = vsyncpa [#allocation3], 1 }

// kernel: smpl_forward.3
= control target key start
LH: loop header
LB: loop body
LE: loop exit
PB: predicated region body
PF: predicated region fallthrough
CT: control target
= control target key end

     0   :  { %vm40_vm0 = vcmask 1043456   ;;  %vm33_vm1 = vcmask 195584   ;;  %s181_s1 = inlined_call_operand.vmem [shape: bf16[24,128], index: 1, kind: input, shape index: {}]   ;;  %s182_s0 = inlined_call_operand.vmem [shape: f32[32,24], index: 0, kind: input, shape index: {}]   ;;  %s183_s2 = inlined_call_operand.vmem [shape: f32[32,128], index: 2, kind: input, shape index: {}]   ;;  %s184_s3 = inlined_call_operand.vmem [shape: f32[8,128], index: 3, kind: output, shape index: {}]  }
   0x1   :  { %v126_v0 = vld [vmem:[%s181_s1] sm:$0xff]   ;;  %v127_v1 = vld [vmem:[%s181_s1 + $0x8] ss:$0 sps:$4 sm:$0xff]   ;;  %v17_v5 = vld [vmem:[%s182_s0 + $0x10] sm:$0xff] }
   0x2   :  { %v15_v2 = vld [vmem:[%s182_s0] sm:$0xff]  ;;  %v16_v3 = vld [vmem:[%s182_s0 + $0x8] sm:$0xff]  ;;  %117 = vmatprep.subr.bf16.mxu0 %v126_v0  ;;  %v18_v6 = vld [vmem:[%s182_s0 + $0x18] sm:$0xff]  ;;  %v42_v7 = vsel %vm40_vm0, %v127_v1, 0 }
   0x3   :  { %v19_v4 = vpack.c.bf16 %v16_v3, %v15_v2  ;;  %118 = vmatpush3.bf16.msra.mxu0 %v126_v0  ;;  %v20_v8 = vpack.c.bf16 %v18_v6, %v17_v5  ;;  %v93_v11 = vld [vmem:[%s183_s2] sm:$0xff]  ;;  %v94_v12 = vld [vmem:[%s183_s2 + $0x8] sm:$0xff]  ;;  %v95_v14 = vld [vmem:[%s183_s2 + $0x10] sm:$0xff] }
   0x4   :  { %125 = vmatprep.subr.msk.bf16.mxu0 %vm40_vm0, %v127_v1  ;;  %v96_v18 = vld [vmem:[%s183_s2 + $0x18] sm:$0xff] }
   0x5   :  { %121 = vmatprep.mubr.msk.bf16.mxu0 %vm33_vm1, %v19_v4 }
   0x7   :  { %120 = vmatpush3.bf16.msra.mxu0 %v42_v7 }
   0xa   :  { %122 = vmatmul.mubr.msk.bf16.vlgmr.msra.gmra.mrb[0].mxu0 %vm33_vm1, %v20_v8 }
  0xdd   :  { %v123_v9 = vpop.f32.mrb[0].mxu0 }
  0xde   :  { %v78_v10 = vpop.f32.mrb[1].mxu0  ;;  %v100_v19 = vmul.f32 %v123_v9, %v95_v14 }
  0xdf   :  { %v124_v13 = vpop.f32.mrb[2].mxu0  ;;  %v97_v16 = vmul.f32 %v93_v11, %v78_v10 }
  0xe0   :  { %v81_v15 = vpop.f32.mrb[3].mxu0  ;;  %v102_v21 = vmul.f32 %v124_v13, %v96_v18 }
  0xe1   :  { %v98_v17 = vmul.f32 %v94_v12, %v81_v15 }
  0xe3   :  { %v99_v20 = vadd.f32 %v98_v17, %v97_v16 }
  0xe5   :  { %v101_v22 = vadd.f32 %v100_v19, %v99_v20 }
  0xe7   :  { %v103_v23 = vadd.f32 %v102_v21, %v101_v22 }
  0xe9   :  { %104 = vst [vmem:[%s184_s3] sm:$0xff] %v103_v23 }

</bundles_post_ra>
